<compile_context>
chip_gen: v7x
topology: tpu7x:2x2x1
jax: 0.10.0
libtpu: 0.0.40
codegen_flags: <defaults>
</compile_context>

<pallas_src>
import jax
import jax.numpy as jnp
from jax.experimental import pallas as pl
from jax.experimental.pallas import tpu as pltpu


def _round_up(x, m):
    return ((x + m - 1) // m) * m


def simple_classifier_kernel(x_ref, w1_ref, b1_ref, w2_ref, b2_ref, o_ref):
    L = o_ref.shape[-1]                                   # real (unpadded) label count

    # In-kernel bf16 cast of the activations (wrapper no longer pre-casts x).
    x = x_ref[...].astype(jnp.bfloat16)

    # linear1 on the MXU: bf16 operands, f32 accumulation, lane-dense N=128.
    h = jnp.dot(x, w1_ref[...], preferred_element_type=jnp.float32)
    h = jnp.maximum(h + b1_ref[...], 0.0)                 # clamp(min=0) == ReLU

    # linear2 on the MXU: lane-dense K=128 and N=128 (label axis padded).
    logits = jnp.dot(h.astype(jnp.bfloat16), w2_ref[...],
                     preferred_element_type=jnp.float32) + b2_ref[...]

    # log_softmax over the padded label axis; padded columns carry a -1e30 bias
    # so exp(logits - m) underflows to exactly 0 there (all f32 in-kernel).
    m = jnp.max(logits, axis=1, keepdims=True)
    lse = m + jnp.log(jnp.sum(jnp.exp(logits - m), axis=1, keepdims=True))

    # Store only the real labels: unpadded writeback (~8x fewer HBM bytes than
    # the 128-wide padded f32 slab) and no wrapper column-slice afterwards.
    o_ref[...] = (logits - lse)[:, :L]


def prepare_params(w1, b1, w2, b2):
    """One-time layout prep (hoisted out of the per-call path).

    PyTorch layouts: w1 [hidden, in], b1 [hidden], w2 [labels, hidden], b2 [labels].
    Hidden and label axes are padded to multiples of 128 for lane-dense MXU use.
    """
    hid, in_f = w1.shape
    L = w2.shape[0]
    H_pad = _round_up(max(hid, 128), 128)
    L_pad = _round_up(max(L, 128), 128)

    w1_t = (jnp.zeros((in_f, H_pad), jnp.bfloat16)
            .at[:, :hid].set(w1.T.astype(jnp.bfloat16)))          # [in, H_pad]
    b1_r = (jnp.zeros((1, H_pad), jnp.float32)
            .at[:, :hid].set(b1.reshape(1, hid).astype(jnp.float32)))
    w2_p = (jnp.zeros((H_pad, L_pad), jnp.bfloat16)
            .at[:hid, :L].set(w2.T.astype(jnp.bfloat16)))          # [H_pad, L_pad]
    # -1e30 on padded label columns -> exp underflows to 0 in f32 (must stay
    # f32: in bf16 this would overflow to -inf and could NaN the pad columns).
    b2_p = (jnp.full((1, L_pad), -1e30, jnp.float32)
            .at[:, :L].set(b2.reshape(1, L).astype(jnp.float32)))

    return {"w1_t": w1_t, "b1_r": b1_r, "w2_p": w2_p, "b2_p": b2_p,
            "num_labels": L}


def _pick_block_b(B, requested):
    """Sublane-aligned batch tile; keeps >=2 tiles (when B allows) so the
    'parallel' batch axis can shard across v7x's two TensorCores."""
    bb = min(requested, B)
    if B >= 256 and bb * 2 > B:
        bb = _round_up(-(-B // 2), 128)     # split into ~2 tiles, 128-aligned
    if bb < B:
        bb = max(8, (bb // 8) * 8)          # partial-batch tiles must be mult-of-8
    return max(1, bb)


def simple_classifier_fwd(x, params, *, block_b=1024):
    """x: [B, input_size] f32; params: output of prepare_params()."""
    B, in_f = x.shape
    L = params["num_labels"]
    w1_t, b1_r = params["w1_t"], params["b1_r"]
    w2_p, b2_p = params["w2_p"], params["b2_p"]
    H_pad, L_pad = w1_t.shape[1], w2_p.shape[1]

    bb = _pick_block_b(B, block_b)
    n_tiles = pl.cdiv(B, bb)
    B_pad = n_tiles * bb
    if B_pad != B:                              # only pads when B % bb != 0
        x = jnp.zeros((B_pad, in_f), x.dtype).at[:B].set(x)

    grid_spec = pltpu.PrefetchScalarGridSpec(
        num_scalar_prefetch=0,
        grid=(n_tiles,),
        in_specs=[
            pl.BlockSpec((bb, in_f),     lambda i: (i, 0)),   # x: batch-tiled, f32
            pl.BlockSpec((in_f, H_pad),  lambda i: (0, 0)),   # weights VMEM-resident
            pl.BlockSpec((1, H_pad),     lambda i: (0, 0)),
            pl.BlockSpec((H_pad, L_pad), lambda i: (0, 0)),
            pl.BlockSpec((1, L_pad),     lambda i: (0, 0)),
        ],
        out_specs=pl.BlockSpec((bb, L), lambda i: (i, 0)),    # unpadded label axis
    )

    out = pl.pallas_call(
        simple_classifier_kernel,
        out_shape=jax.ShapeDtypeStruct((B_pad, L), jnp.float32),
        grid_spec=grid_spec,
        # Per-step VMEM at block_b=1024 is well under the 32 MiB scoped default
        # on every generation (incl. v7x's 64 MiB physical), so no explicit
        # vmem_limit_bytes is needed; revisit if block_b grows past ~16K rows.
        compiler_params=pltpu.CompilerParams(
            dimension_semantics=("parallel",),   # shard batch tiles across TCs (v7x)
        ),
    )(x, w1_t, b1_r, w2_p, b2_p)

    # TODO(synk): if feature dims ever grow large (e.g. 4k x 4k weights), add a
    # K grid axis + f32 VMEM accumulator with pl.when init/finalize so the
    # whole-array weight blocks fit the 64 MiB v7x VMEM budget.
    return out if B_pad == B else out[:B]


def init_params(key, input_size, hidden_size, num_labels):
    """PyTorch-style nn.Linear init: uniform(+/- 1/sqrt(fan_in)), [out, in] layout."""
    k1, k2, k3, k4 = jax.random.split(key, 4)
    lim1 = 1.0 / jnp.sqrt(input_size)
    lim2 = 1.0 / jnp.sqrt(hidden_size)
    w1 = jax.random.uniform(k1, (hidden_size, input_size), jnp.float32, -lim1, lim1)
    b1 = jax.random.uniform(k2, (hidden_size,), jnp.float32, -lim1, lim1)
    w2 = jax.random.uniform(k3, (num_labels, hidden_size), jnp.float32, -lim2, lim2)
    b2 = jax.random.uniform(k4, (num_labels,), jnp.float32, -lim2, lim2)
    return w1, b1, w2, b2


def reference(x, w1, b1, w2, b2):
    """Pure-JAX reference with the same bf16 matmul operands / f32 accumulation."""
    h = jnp.dot(x.astype(jnp.bfloat16), w1.T.astype(jnp.bfloat16),
                preferred_element_type=jnp.float32) + b1[None, :]
    h = jnp.maximum(h, 0.0)
    logits = jnp.dot(h.astype(jnp.bfloat16), w2.T.astype(jnp.bfloat16),
                     preferred_element_type=jnp.float32) + b2[None, :]
    m = jnp.max(logits, axis=1, keepdims=True)
    return logits - (m + jnp.log(jnp.sum(jnp.exp(logits - m), axis=1, keepdims=True)))


if __name__ == "__main__":
    B, INPUT_SIZE, HIDDEN_SIZE, NUM_LABELS = 256, 32, 32, 16

    key = jax.random.PRNGKey(0)
    kx, kp = jax.random.split(key)
    x = jax.random.normal(kx, (B, INPUT_SIZE), dtype=jnp.float32)
    w1, b1, w2, b2 = init_params(kp, INPUT_SIZE, HIDDEN_SIZE, NUM_LABELS)

    # Parameter prep happens once, outside the per-call path.
    params = prepare_params(w1, b1, w2, b2)

    # block_b=128 -> grid=(2,): one batch tile per v7x TensorCore.
    out = simple_classifier_fwd(x, params, block_b=128)
    out = jax.block_until_ready(out)

    assert out.shape == (B, NUM_LABELS)
    # log_softmax rows must sum (in prob space) to ~1
    row_sums = jnp.sum(jnp.exp(out), axis=1)
    assert bool(jnp.all(jnp.abs(row_sums - 1.0) < 1e-4))
    # match the bf16-operand reference
    ref = reference(x, w1, b1, w2, b2)
    assert bool(jnp.max(jnp.abs(out - ref)) < 1e-3)

    print("KERNEL_OK")
</pallas_src>

<mosaic_0001>
module attributes {stable_mosaic.version = 11 : i64} {
  func.func @simple_classifier_kernel(%arg0: i32, %arg1: memref<128x32xf32, #tpu.memory_space<vmem>>, %arg2: memref<32x128xbf16, #tpu.memory_space<vmem>>, %arg3: memref<1x128xf32, #tpu.memory_space<vmem>>, %arg4: memref<128x128xbf16, #tpu.memory_space<vmem>>, %arg5: memref<1x128xf32, #tpu.memory_space<vmem>>, %arg6: memref<128x16xf32, #tpu.memory_space<vmem>>) attributes {dimension_semantics = [#tpu.dimension_semantics<parallel>], iteration_bounds = array<i64: 2>, scalar_prefetch = 0 : i64, scratch_operands = 0 : i64, tpu.core_type = #tpu.core_type<tc>, window_params = [{transform_indices = @transform_0, window_bounds = array<i64: 128, 32>}, {pipeline_mode = #tpu.pipeline_mode<synchronous>, transform_indices = @transform_1, window_bounds = array<i64: 32, 128>}, {pipeline_mode = #tpu.pipeline_mode<synchronous>, transform_indices = @transform_2, window_bounds = array<i64: 1, 128>}, {pipeline_mode = #tpu.pipeline_mode<synchronous>, transform_indices = @transform_3, window_bounds = array<i64: 128, 128>}, {pipeline_mode = #tpu.pipeline_mode<synchronous>, transform_indices = @transform_4, window_bounds = array<i64: 1, 128>}, {transform_indices = @transform_5, window_bounds = array<i64: 128, 16>}]} {
    %c0 = arith.constant 0 : index
    %c0_0 = arith.constant 0 : index
    %0 = vector.load %arg1[%c0, %c0_0] : memref<128x32xf32, #tpu.memory_space<vmem>>, vector<128x32xf32>
    %1 = arith.truncf %0 : vector<128x32xf32> to vector<128x32xbf16>
    %c0_1 = arith.constant 0 : index
    %c0_2 = arith.constant 0 : index
    %2 = vector.load %arg2[%c0_1, %c0_2] : memref<32x128xbf16, #tpu.memory_space<vmem>>, vector<32x128xbf16>
    %cst = arith.constant dense<0.000000e+00> : vector<128x128xf32>
    %3 = tpu.matmul %1, %2, %cst {dimension_numbers = #tpu.dot_dimension_numbers<[1], [0], [0], [1], [0, 0, 1, 1], [], []>} : vector<128x32xbf16>, vector<32x128xbf16>, vector<128x128xf32> -> vector<128x128xf32>
    %c0_3 = arith.constant 0 : index
    %c0_4 = arith.constant 0 : index
    %4 = vector.load %arg3[%c0_3, %c0_4] : memref<1x128xf32, #tpu.memory_space<vmem>>, vector<1x128xf32>
    %5 = vector.broadcast %4 : vector<1x128xf32> to vector<128x128xf32>
    %6 = arith.addf %3, %5 : vector<128x128xf32>
    %cst_5 = arith.constant 0.000000e+00 : f32
    %7 = vector.broadcast %cst_5 : f32 to vector<128x128xf32>
    %8 = arith.maximumf %6, %7 : vector<128x128xf32>
    %9 = arith.truncf %8 : vector<128x128xf32> to vector<128x128xbf16>
    %c0_6 = arith.constant 0 : index
    %c0_7 = arith.constant 0 : index
    %10 = vector.load %arg4[%c0_6, %c0_7] : memref<128x128xbf16, #tpu.memory_space<vmem>>, vector<128x128xbf16>
    %cst_8 = arith.constant dense<0.000000e+00> : vector<128x128xf32>
    %11 = tpu.matmul %9, %10, %cst_8 {dimension_numbers = #tpu.dot_dimension_numbers<[1], [0], [0], [1], [0, 0, 1, 1], [], []>} : vector<128x128xbf16>, vector<128x128xbf16>, vector<128x128xf32> -> vector<128x128xf32>
    %c0_9 = arith.constant 0 : index
    %c0_10 = arith.constant 0 : index
    %12 = vector.load %arg5[%c0_9, %c0_10] : memref<1x128xf32, #tpu.memory_space<vmem>>, vector<1x128xf32>
    %13 = vector.broadcast %12 : vector<1x128xf32> to vector<128x128xf32>
    %14 = arith.addf %11, %13 : vector<128x128xf32>
    %cst_11 = arith.constant dense<0xFF800000> : vector<128xf32>
    %15 = vector.multi_reduction <maximumf>, %14, %cst_11 [1] : vector<128x128xf32> to vector<128xf32>
    %16 = vector.shape_cast %15 : vector<128xf32> to vector<128x1xf32>
    %17 = vector.broadcast %16 : vector<128x1xf32> to vector<128x128xf32>
    %18 = arith.subf %14, %17 : vector<128x128xf32>
    %19 = math.exp %18 : vector<128x128xf32>
    %cst_12 = arith.constant dense<0.000000e+00> : vector<128xf32>
    %20 = vector.multi_reduction <add>, %19, %cst_12 [1] : vector<128x128xf32> to vector<128xf32>
    %21 = vector.shape_cast %20 : vector<128xf32> to vector<128x1xf32>
    %22 = math.log %21 : vector<128x1xf32>
    %23 = arith.addf %16, %22 : vector<128x1xf32>
    %24 = vector.broadcast %23 : vector<128x1xf32> to vector<128x128xf32>
    %25 = arith.subf %14, %24 : vector<128x128xf32>
    %26 = vector.extract_strided_slice %25 {offsets = [0, 0], sizes = [128, 16], strides = [1, 1]} : vector<128x128xf32> to vector<128x16xf32>
    %c0_13 = arith.constant 0 : index
    %c0_14 = arith.constant 0 : index
    %27 = vector.load %arg6[%c0_13, %c0_14] : memref<128x16xf32, #tpu.memory_space<vmem>>, vector<128x16xf32>
    tpu.vector_store %arg6[%c0_13, %c0_14], %26 {strides = array<i32>} : memref<128x16xf32, #tpu.memory_space<vmem>>, vector<128x16xf32>,
    return
  }
  func.func @transform_0(%arg0: i32) -> (i32, i32) {
    %c0_i32 = arith.constant 0 : i32
    %c0_i32_0 = arith.constant 0 : i32
    return %arg0, %c0_i32 : i32, i32
  }
  func.func @transform_1(%arg0: i32) -> (i32, i32) {
    %c0_i32 = arith.constant 0 : i32
    %c0_i32_0 = arith.constant 0 : i32
    %c0_i32_1 = arith.constant 0 : i32
    return %c0_i32, %c0_i32_0 : i32, i32
  }
  func.func @transform_2(%arg0: i32) -> (i32, i32) {
    %c0_i32 = arith.constant 0 : i32
    %c0_i32_0 = arith.constant 0 : i32
    %c0_i32_1 = arith.constant 0 : i32
    return %c0_i32, %c0_i32_0 : i32, i32
  }
  func.func @transform_3(%arg0: i32) -> (i32, i32) {
    %c0_i32 = arith.constant 0 : i32
    %c0_i32_0 = arith.constant 0 : i32
    %c0_i32_1 = arith.constant 0 : i32
    return %c0_i32, %c0_i32_0 : i32, i32
  }
  func.func @transform_4(%arg0: i32) -> (i32, i32) {
    %c0_i32 = arith.constant 0 : i32
    %c0_i32_0 = arith.constant 0 : i32
    %c0_i32_1 = arith.constant 0 : i32
    return %c0_i32, %c0_i32_0 : i32, i32
  }
  func.func @transform_5(%arg0: i32) -> (i32, i32) {
    %c0_i32 = arith.constant 0 : i32
    %c0_i32_0 = arith.constant 0 : i32
    return %arg0, %c0_i32 : i32, i32
  }
}

</mosaic_0001>

<bundles_post_ra>
// kernel: tpu_custom_call.1
= control target key start
LH: loop header
LB: loop body
LE: loop exit
PB: predicated region body
PF: predicated region fallthrough
CT: control target
= control target key end

     0   :  { %s1084_s18 = smov 0   ;;  %s1348_s0 = inlined_call_operand.vmem [shape: f32[256,32], index: 0, kind: input, shape index: {}]   ;;  %s1349_s1 = inlined_call_operand.vmem [shape: bf16[32,128], index: 1, kind: input, shape index: {}]   ;;  %s1350_s2 = inlined_call_operand.vmem [shape: f32[1,128], index: 2, kind: input, shape index: {}]   ;;  %s1351_s3 = inlined_call_operand.vmem [shape: bf16[128,128], index: 3, kind: input, shape index: {}]   ;;  %s1352_s4 = inlined_call_operand.vmem [shape: f32[1,128], index: 4, kind: input, shape index: {}]   ;;  %s1353_s5 = inlined_call_operand.vmem [shape: f32[256,16], index: 5, kind: output, shape index: {}]  }
   0x1 LB: > { %s839_s19 = sadd.s32 4294967295, %s1052_s18   ;;  %p843_p0 = scmp.ge.s32.totalorder %s1052_s18, 1  ;;  %s1052_s18 = sphi %s1084_s18, %s15_s18  }
   0x2   : > { %p188_p1 = scmp.lt.s32.totalorder %s1052_s18, 3 }
   0x4   : > { %p189_p2 = pnand %p843_p0, %p188_p1 }
   0x5   : > { %v972_v0 = vld [vmem:[%s1349_s1] sm:$0xff] (!%p189_p2)   ;;  %s844_s22 = sshll.u32 (!%p189_p2), %s839_s19, 4  ;;  %v973_v1 = vld [vmem:[%s1349_s1 + $0x8] sm:$0xff] (!%p189_p2)   ;;  %v976_v4 = vld [vmem:[%s1351_s3 + $0x10] sm:$0xff] (!%p189_p2)   ;;  %vm276_vm0 = vcmask (!%p189_p2), 261120   ;;  %vm766_vm1 = vcmask (!%p189_p2), 130048  }
   0x6   : > { %192 = sbr.rel (%p189_p2) target bundleno = 805 (0x325), region = 40  ;;  %p217_p3 = scmp.lt.s32.totalorder (!%p189_p2), %s844_s22, 31  ;;  %896 = vmatprep.subr.bf16.mxu0 (!%p189_p2), %v972_v0  ;;  %v974_v2 = vld [vmem:[%s1351_s3] sm:$0xff] (!%p189_p2)   ;;  %v975_v3 = vld [vmem:[%s1351_s3 + $0x8] sm:$0xff] (!%p189_p2)   ;;  %v977_v16 = vld [vmem:[%s1351_s3 + $0x18] sm:$0xff] (!%p189_p2)  }
   0x7   : > { %897 = vmatpush3.bf16.msra.mxu0 (!%p189_p2), %v972_v0  ;;  %948 = vmatprep.subr.bf16.mxu1 (!%p189_p2), %v974_v2  ;;  %v978_v21 = vld [vmem:[%s1351_s3 + $0x20] sm:$0xff] (!%p189_p2)   ;;  %v979_v24 = vld [vmem:[%s1351_s3 + $0x28] sm:$0xff] (!%p189_p2)   ;;  %v980_v32 = vld [vmem:[%s1351_s3 + $0x30] sm:$0xff] (!%p189_p2)  }
   0x8   : > { %898 = vmatprep.subr.bf16.mxu0 (!%p189_p2), %v973_v1  ;;  %956 = vmatpush3.bf16.msra.mxu1 (!%p189_p2), %v974_v2  ;;  %v981_v33 = vld [vmem:[%s1351_s3 + $0x38] sm:$0xff] (!%p189_p2)   ;;  %v848_v34 = vld [vmem:[%s1350_s2] ss:$0 sm:$0xff] (!%p189_p2) }
   0x9   : > { %949 = vmatprep.subr.bf16.mxu1 (!%p189_p2), %v975_v3 }
   0xb   : > { %899 = vmatpush3.bf16.msra.mxu0 (!%p189_p2), %v973_v1 }
   0xc   : > { %916 = vmatprep.subr.bf16.mxu0 (!%p189_p2), %v974_v2  ;;  %957 = vmatpush3.bf16.msra.mxu1 (!%p189_p2), %v975_v3 }
   0xd   : > { %s1355_s22 = smov (!%p217_p3, %s844_s22), 31  ;;  %950 = vmatprep.subr.bf16.mxu1 %v976_v4 }
   0xe   : > { %s845_s29 = sshll.u32 %s1355_s22, 3 }
   0xf   : > { %s1112_s7 = scalar_lea.vmem %s1348_s0, %s845_s29  ;;  %s1280_s28 = scalar_lea.vmem %s1353_s5, %s845_s29 }
  0x10   : > { %v229_v5 = vld [vmem:[%s1112_s7] sm:$0xff]  ;;  %v230_v6 = vld [vmem:[%s1112_s7 + $0x8] sm:$0xff]  ;;  %v231_v7 = vld [vmem:[%s1112_s7 + $0x10] sm:$0xff]  ;;  %958 = vmatpush3.bf16.msra.mxu1 %v976_v4 }
  0x11   : > { %v245_v8 = vpack.c.bf16 %v230_v6, %v229_v5  ;;  %v232_v9 = vld [vmem:[%s1112_s7 + $0x18] sm:$0xff]  ;;  %v233_v10 = vld [vmem:[%s1112_s7 + $0x20] sm:$0xff]  ;;  %v234_v11 = vld [vmem:[%s1112_s7 + $0x28] sm:$0xff]  ;;  %951 = vmatprep.subr.bf16.mxu1 %v977_v16 }
  0x12   : > { %v246_v12 = vpack.c.bf16 %v232_v9, %v231_v7  ;;  %v247_v13 = vpack.c.bf16 %v234_v11, %v233_v10  ;;  %v235_v14 = vld [vmem:[%s1112_s7 + $0x30] sm:$0xff]  ;;  %v236_v15 = vld [vmem:[%s1112_s7 + $0x38] sm:$0xff]  ;;  %v237_v17 = vld [vmem:[%s1112_s7 + $0x40] sm:$0xff] }
  0x13   : > { %900 = vmatprep.mubr.msk.bf16.mxu0 %vm276_vm0, %v245_v8  ;;  %v238_v18 = vld [vmem:[%s1112_s7 + $0x48] sm:$0xff]  ;;  %v248_v19 = vpack.c.bf16 %v236_v15, %v235_v14  ;;  %v239_v22 = vld [vmem:[%s1112_s7 + $0x50] sm:$0xff]  ;;  %v240_v23 = vld [vmem:[%s1112_s7 + $0x58] sm:$0xff] }
  0x14   : > { %901 = vmatmul.mubr.msk.bf16.vlgmr.msra.gmra.mrb[0].mxu0 %vm276_vm0, %v246_v12  ;;  %v249_v20 = vpack.c.bf16 %v238_v18, %v237_v17  ;;  %959 = vmatpush3.bf16.msra.mxu1 %v977_v16  ;;  %v241_v25 = vld [vmem:[%s1112_s7 + $0x60] sm:$0xff]  ;;  %v242_v26 = vld [vmem:[%s1112_s7 + $0x68] sm:$0xff]  ;;  %v250_v27 = vpack.c.bf16 %v240_v23, %v239_v22  ;;  %v243_v29 = vld [vmem:[%s1112_s7 + $0x70] sm:$0xff] }
  0x15   : > { %904 = vmatprep.mubr.msk.bf16.mxu0 %vm276_vm0, %v247_v13  ;;  %917 = vmatpush3.bf16.msra.mxu0 %v974_v2  ;;  %v251_v28 = vpack.c.bf16 %v242_v26, %v241_v25  ;;  %v244_v30 = vld [vmem:[%s1112_s7 + $0x78] sm:$0xff] }
  0x16   : > { %918 = vmatprep.subr.bf16.mxu0 %v975_v3  ;;  %952 = vmatprep.subr.bf16.mxu1 %v978_v21  ;;  %v252_v31 = vpack.c.bf16 %v244_v30, %v243_v29 }
  0x18   : > { %960 = vmatpush3.bf16.msra.mxu1 %v978_v21 }
  0x19   : > { %919 = vmatpush3.bf16.msra.mxu0 %v975_v3  ;;  %953 = vmatprep.subr.bf16.mxu1 %v979_v24 }
  0x1a   : > { %920 = vmatprep.subr.bf16.mxu0 %v976_v4 }
  0x1c   : > { %905 = vmatmul.mubr.msk.bf16.gmra.mrb[4].mxu0 %vm276_vm0, %v248_v19  ;;  %961 = vmatpush3.bf16.msra.mxu1 %v979_v24 }
  0x1d   : > { %908 = vmatprep.mubr.msk.bf16.mxu0 %vm276_vm0, %v249_v20  ;;  %921 = vmatpush3.bf16.msra.mxu0 %v976_v4 }
  0x1e   : > { %922 = vmatprep.subr.bf16.mxu0 %v977_v16  ;;  %954 = vmatprep.subr.bf16.mxu1 %v980_v32 }
  0x20   : > { %962 = vmatpush3.bf16.msra.mxu1 %v980_v32 }
  0x21   : > { %923 = vmatpush3.bf16.msra.mxu0 %v977_v16  ;;  %955 = vmatprep.subr.bf16.mxu1 %v981_v33 }
  0x22   : > { %924 = vmatprep.subr.bf16.mxu0 %v978_v21 }
  0x24   : > { %909 = vmatmul.mubr.msk.bf16.gmra.mrb[8].mxu0 %vm276_vm0, %v250_v27  ;;  %963 = vmatpush3.bf16.msra.mxu1 %v981_v33  ;;  %v859_v27 = vld [vmem:[%s1352_s4] ss:$0 sm:$0xff] }
  0x25   : > { %912 = vmatprep.mubr.msk.bf16.mxu0 %vm276_vm0, %v251_v28  ;;  %925 = vmatpush3.bf16.msra.mxu0 %v978_v21 }
  0x26   : > { %926 = vmatprep.subr.bf16.mxu0 %v979_v24 }
  0x29   : > { %927 = vmatpush3.bf16.msra.mxu0 %v979_v24 }
  0x2a   : > { %928 = vmatprep.subr.bf16.mxu0 %v980_v32 }
  0x2c   : > { %913 = vmatmul.mubr.msk.bf16.gmra.mrb[12].mxu0 %vm276_vm0, %v252_v31 }
  0x2d   : > { %929 = vmatpush3.bf16.msra.mxu0 %v980_v32 }
  0x2e   : > { %930 = vmatprep.subr.bf16.mxu0 %v981_v33 }
  0x31   : > { %931 = vmatpush3.bf16.msra.mxu0 %v981_v33 }
  0xe7   : > { %v902_v35 = vpop.f32.mrb[0].mxu0 }
  0xe8   : > { %v344_v36 = vadd.f32 %v902_v35, %v848_v34  ;;  %v335_v37 = vpop.f32.mrb[1].mxu0 }
  0xe9   : > { %v336_v38 = vadd.f32 %v848_v34, %v335_v37  ;;  %v903_v39 = vpop.f32.mrb[2].mxu0 }
  0xea   : > { %v347_v40 = vadd.f32 %v903_v39, %v848_v34  ;;  %v338_v41 = vpop.f32.mrb[3].mxu0  ;;  %v400_v43 = vmax.f32 %v344_v36, 0.0 }
  0xeb   : > { %v339_v42 = vadd.f32 %v848_v34, %v338_v41  ;;  %v398_v45 = vmax.f32 %v336_v38, 0.0 }
  0xec   : > { %v401_v44 = vmax.f32 %v347_v40, 0.0 }
  0xed   : > { %v399_v46 = vmax.f32 %v339_v42, 0.0 }
  0xee   : > { %v415_v47 = vpack.c.bf16 %v401_v44, %v400_v43 }
  0xef   : > { %v414_v48 = vpack.c.bf16 %v399_v46, %v398_v45  ;;  %v906_v49 = vpop.f32.mrb[4].mxu0 }
  0xf0   : > { %v360_v50 = vadd.f32 %v906_v49, %v848_v34  ;;  %v351_v51 = vpop.f32.mrb[5].mxu0 }
  0xf1   : > { %v352_v52 = vadd.f32 %v848_v34, %v351_v51  ;;  %v907_v53 = vpop.f32.mrb[6].mxu0  ;;  %932 = vmatprep.mubr.bf16.mxu0 %v414_v48 }
  0xf2   : > { %v404_v54 = vmax.f32 %v360_v50, 0.0  ;;  %v363_v55 = vadd.f32 %v907_v53, %v848_v34  ;;  %v354_v56 = vpop.f32.mrb[7].mxu0  ;;  %933 = vmatmul.mubr.bf16.vlgmr.msra.gmra.mrb[16].mxu0 %v415_v47 }
  0xf3   : > { %v355_v57 = vadd.f32 %v848_v34, %v354_v56  ;;  %v402_v59 = vmax.f32 %v352_v52, 0.0 }
  0xf4   : > { %v405_v58 = vmax.f32 %v363_v55, 0.0 }
  0xf5   : > { %v403_v60 = vmax.f32 %v355_v57, 0.0 }
  0xf6   : > { %v417_v61 = vpack.c.bf16 %v405_v58, %v404_v54 }
  0xf7   : > { %v910_v62 = vpop.f32.mrb[8].mxu0  ;;  %v416_v63 = vpack.c.bf16 %v403_v60, %v402_v59 }
  0xf8   : > { %v376_v0 = vadd.f32 %v910_v62, %v848_v34  ;;  %v367_v1 = vpop.f32.mrb[9].mxu0 }
  0xf9   : > { %v368_v2 = vadd.f32 %v848_v34, %v367_v1  ;;  %v911_v3 = vpop.f32.mrb[10].mxu0  ;;  %936 = vmatprep.mubr.bf16.mxu1 %v416_v63 }
  0xfa   : > { %v408_v4 = vmax.f32 %v376_v0, 0.0  ;;  %v379_v5 = vadd.f32 %v911_v3, %v848_v34  ;;  %v370_v6 = vpop.f32.mrb[11].mxu0  ;;  %937 = vmatmul.mubr.bf16.vlgmr.msra.gmra.mrb[0].mxu1 %v417_v61 }
  0xfb   : > { %v371_v7 = vadd.f32 %v848_v34, %v370_v6  ;;  %v406_v9 = vmax.f32 %v368_v2, 0.0 }
  0xfc   : > { %v409_v8 = vmax.f32 %v379_v5, 0.0 }
  0xfd   : > { %v407_v10 = vmax.f32 %v371_v7, 0.0 }
  0xfe   : > { %v419_v11 = vpack.c.bf16 %v409_v8, %v408_v4 }
  0xff   : > { %v418_v12 = vpack.c.bf16 %v407_v10, %v406_v9  ;;  %v914_v13 = vpop.f32.mrb[12].mxu0 }
 0x100   : > { %v392_v14 = vadd.f32 %v914_v13, %v848_v34  ;;  %v383_v15 = vpop.f32.mrb[13].mxu0 }
 0x101   : > { %v384_v16 = vadd.f32 %v848_v34, %v383_v15  ;;  %v915_v17 = vpop.f32.mrb[14].mxu0  ;;  %940 = vmatprep.mubr.bf16.mxu1 %v418_v12 }
 0x102   : > { %v412_v18 = vmax.f32 %v392_v14, 0.0  ;;  %v395_v19 = vadd.f32 %v915_v17, %v848_v34  ;;  %v386_v20 = vpop.f32.mrb[15].mxu0  ;;  %941 = vmatmul.mubr.bf16.gmra.mrb[4].mxu1 %v419_v11 }
 0x103   : > { %v387_v21 = vadd.f32 %v848_v34, %v386_v20  ;;  %v410_v23 = vmax.f32 %v384_v16, 0.0 }
 0x104   : > { %v413_v22 = vmax.f32 %v395_v19, 0.0 }
 0x105   : > { %v411_v24 = vmax.f32 %v387_v21, 0.0 }
 0x106   : > { %v421_v25 = vpack.c.bf16 %v413_v22, %v412_v18 }
 0x107   : > { %v420_v26 = vpack.c.bf16 %v411_v24, %v410_v23 }
 0x109   : > { %944 = vmatprep.mubr.bf16.mxu1 %v420_v26 }
 0x10a   : > { %945 = vmatmul.mubr.bf16.gmra.mrb[8].mxu1 %v421_v25 }
 0x1c5   : > { %v934_v28 = vpop.f32.mrb[16].mxu0 }
 0x1c6   : > { %v1162_v29 = vadd.f32 %v934_v28, %v859_v27  ;;  %v527_v30 = vpop.f32.mrb[17].mxu0 }
 0x1c7   : > { %v1164_v31 = vadd.f32 %v859_v27, %v527_v30  ;;  %v935_v32 = vpop.f32.mrb[18].mxu0 }
 0x1c8   : > { %594 = vmax.xlane.f32.xlu1 %v1162_v29  ;;  %v530_v33 = vpop.f32.mrb[19].mxu0  ;;  %v1168_v34 = vadd.f32 %v935_v32, %v859_v27 }
 0x1c9   : > { %590 = vmax.xlane.f32.xlu0 %v1164_v31  ;;  %v1170_v35 = vadd.f32 %v859_v27, %v530_v33 }
 0x1cc   : > { %596 = vmax.xlane.f32.xlu1 %v1168_v34 }
 0x1cd   : > { %v938_v36 = vpop.f32.mrb[0].mxu1  ;;  %592 = vmax.xlane.f32.xlu0 %v1170_v35 }
 0x1ce   : > { %v1174_v37 = vadd.f32 %v938_v36, %v859_v27  ;;  %v543_v38 = vpop.f32.mrb[1].mxu1 }
 0x1cf   : > { %v939_v39 = vpop.f32.mrb[2].mxu1  ;;  %v1180_v42 = vadd.f32 %v859_v27, %v543_v38 }
 0x1d0   : > { %v1176_v40 = vadd.f32 %v939_v39, %v859_v27  ;;  %v546_v41 = vpop.f32.mrb[3].mxu1 }
 0x1d1   : > { %602 = vmax.xlane.f32.xlu0 %v1174_v37  ;;  %v1182_v43 = vadd.f32 %v859_v27, %v546_v41 }
 0x1d2   : > { %604 = vmax.xlane.f32.xlu1 %v1176_v40 }
 0x1d5   : > { %v942_v44 = vpop.f32.mrb[4].mxu1  ;;  %598 = vmax.xlane.f32.xlu0 %v1180_v42 }
 0x1d6   : > { %v1185_v45 = vadd.f32 %v942_v44, %v859_v27  ;;  %v559_v46 = vpop.f32.mrb[5].mxu1  ;;  %600 = vmax.xlane.f32.xlu1 %v1182_v43 }
 0x1d7   : > { %v943_v47 = vpop.f32.mrb[6].mxu1  ;;  %v1192_v50 = vadd.f32 %v859_v27, %v559_v46 }
 0x1d8   : > { %v1188_v48 = vadd.f32 %v943_v47, %v859_v27  ;;  %v562_v49 = vpop.f32.mrb[7].mxu1 }
 0x1d9   : > { %610 = vmax.xlane.f32.xlu0 %v1185_v45  ;;  %v1194_v51 = vadd.f32 %v859_v27, %v562_v49 }
 0x1da   : > { %612 = vmax.xlane.f32.xlu1 %v1188_v48 }
 0x1dd   : > { %v946_v52 = vpop.f32.mrb[8].mxu1  ;;  %606 = vmax.xlane.f32.xlu0 %v1192_v50 }
 0x1de   : > { %v575_v53 = vpop.f32.mrb[9].mxu1  ;;  %608 = vmax.xlane.f32.xlu1 %v1194_v51  ;;  %v1203_v58 = vadd.f32 %v946_v52, %v859_v27 }
 0x1df   : > { %v1198_v54 = vadd.f32 %v859_v27, %v575_v53  ;;  %v947_v55 = vpop.f32.mrb[10].mxu1 }
 0x1e0   : > { %v578_v56 = vpop.f32.mrb[11].mxu1  ;;  %v1206_v59 = vadd.f32 %v947_v55, %v859_v27 }
 0x1e1   : > { %v1200_v57 = vadd.f32 %v859_v27, %v578_v56  ;;  %614 = vmax.xlane.f32.xlu0 %v1198_v54 }
 0x1e3   : > { %616 = vmax.xlane.f32.xlu1 %v1200_v57 }
 0x1e5   : > { %618 = vmax.xlane.f32.xlu0 %v1203_v58 }
 0x1e7   : > { %620 = vmax.xlane.f32.xlu1 %v1206_v59 }
 0x255   : > { %v1210_v60 = vpop.xlane.xlu1 %594 }
 0x256   : > { %v624_v61 = vsub.f32 %v1162_v29, %v1210_v60  ;;  %v1214_v62 = vpop.xlane.xlu0 %590 }
 0x257   : > { %v622_v63 = vsub.f32 %v1164_v31, %v1214_v62 }
 0x258   : > { %v642_v0 = vmul.f32 1.442695, %v624_v61 }
 0x259   : > { %v638_v1 = vmul.f32 1.442695, %v622_v63  ;;  %v1218_v2 = vpop.xlane.xlu1 %596 }
 0x25a   : > { %982 = vpow2.f32 %v642_v0  ;;  %v625_v3 = vsub.f32 %v1168_v34, %v1218_v2  ;;  %v1222_v4 = vpop.xlane.xlu0 %592 }
 0x25b   : > { %v623_v5 = vsub.f32 %v1170_v35, %v1222_v4  ;;  %984 = vpow2.f32 %v638_v1 }
 0x25c   : > { %v644_v6 = vmul.f32 1.442695, %v625_v3 }
 0x25d   : > { %v640_v7 = vmul.f32 1.442695, %v623_v5 }
 0x25e   : > { %986 = vpow2.f32 %v644_v6  ;;  %v1226_v8 = vpop.xlane.xlu0 %602 }
 0x25f   : > { %v628_v9 = vsub.f32 %v1174_v37, %v1226_v8  ;;  %v1230_v10 = vpop.xlane.xlu1 %604  ;;  %988 = vpow2.f32 %v640_v7 }
 0x260   : > { %v629_v11 = vsub.f32 %v1176_v40, %v1230_v10 }
 0x261   : > { %v650_v12 = vmul.f32 1.442695, %v628_v9 }
 0x262   : > { %v652_v13 = vmul.f32 1.442695, %v629_v11  ;;  %v1234_v14 = vpop.xlane.xlu0 %598 }
 0x263   : > { %990 = vpow2.f32 %v650_v12  ;;  %v626_v15 = vsub.f32 %v1180_v42, %v1234_v14  ;;  %v1238_v16 = vpop.xlane.xlu1 %600 }
 0x264   : > { %v983_v17 = vpop.eup %982  ;;  %v627_v18 = vsub.f32 %v1182_v43, %v1238_v16  ;;  %992 = vpow2.f32 %v652_v13 }
 0x265   : > { %v646_v19 = vmul.f32 1.442695, %v626_v15  ;;  %674 = vadd.xlane.f32.xlu0 %v983_v17  ;;  %v985_v22 = vpop.eup %984 }
 0x266   : > { %v648_v20 = vmul.f32 1.442695, %v627_v18  ;;  %v1242_v21 = vpop.xlane.xlu0 %610 }
 0x267   : > { %994 = vpow2.f32 %v646_v19  ;;  %v632_v23 = vsub.f32 %v1185_v45, %v1242_v21  ;;  %v1246_v24 = vpop.xlane.xlu1 %612 }
 0x268   : > { %v987_v25 = vpop.eup %986  ;;  %v633_v26 = vsub.f32 %v1188_v48, %v1246_v24  ;;  %996 = vpow2.f32 %v648_v20 }
 0x269   : > { %v658_v27 = vmul.f32 1.442695, %v632_v23  ;;  %676 = vadd.xlane.f32.xlu1 %v987_v25  ;;  %670 = vadd.xlane.f32.xlu0 %v985_v22  ;;  %v989_v36 = vpop.eup %988 }
 0x26a   : > { %v660_v28 = vmul.f32 1.442695, %v633_v26  ;;  %v1250_v30 = vpop.xlane.xlu0 %606 }
 0x26b   : > { %998 = vpow2.f32 %v658_v27  ;;  %v630_v32 = vsub.f32 %v1192_v50, %v1250_v30  ;;  %v1254_v33 = vpop.xlane.xlu1 %608 }
 0x26c   : > { %v631_v38 = vsub.f32 %v1194_v51, %v1254_v33  ;;  %1000 = vpow2.f32 %v660_v28 }
 0x26d   : > { %v991_v39 = vpop.eup %990  ;;  %v654_v41 = vmul.f32 1.442695, %v630_v32  ;;  %672 = vadd.xlane.f32.xlu1 %v989_v36 }
 0x26e   : > { %v656_v44 = vmul.f32 1.442695, %v631_v38  ;;  %682 = vadd.xlane.f32.xlu0 %v991_v39  ;;  %v1258_v46 = vpop.xlane.xlu0 %614  ;;  %v993_v49 = vpop.eup %992 }
 0x26f   : > { %1002 = vpow2.f32 %v654_v41  ;;  %v634_v47 = vsub.f32 %v1198_v54, %v1258_v46 }
 0x270   : > { %v1262_v52 = vpop.xlane.xlu1 %616  ;;  %1004 = vpow2.f32 %v656_v44 }
 0x271   : > { %v995_v53 = vpop.eup %994  ;;  %v662_v55 = vmul.f32 1.442695, %v634_v47  ;;  %v635_v56 = vsub.f32 %v1200_v57, %v1262_v52  ;;  %684 = vadd.xlane.f32.xlu1 %v993_v49 }
 0x272   : > { %678 = vadd.xlane.f32.xlu0 %v995_v53  ;;  %v1266_v61 = vpop.xlane.xlu0 %618  ;;  %v997_v1 = vpop.eup %996 }
 0x273   : > { %1006 = vpow2.f32 %v662_v55  ;;  %v664_v63 = vmul.f32 1.442695, %v635_v56  ;;  %v636_v0 = vsub.f32 %v1203_v58, %v1266_v61 }
 0x274   : > { %v1270_v3 = vpop.xlane.xlu1 %620 }
 0x275   : > { %v999_v5 = vpop.eup %998  ;;  %1008 = vpow2.f32 %v664_v63  ;;  %v666_v6 = vmul.f32 1.442695, %v636_v0  ;;  %v637_v7 = vsub.f32 %v1206_v59, %v1270_v3  ;;  %680 = vadd.xlane.f32.xlu1 %v997_v1 }
 0x276   : > { %690 = vadd.xlane.f32.xlu0 %v999_v5  ;;  %v1001_v11 = vpop.eup %1000 }
 0x277   : > { %1010 = vpow2.f32 %v666_v6  ;;  %v668_v9 = vmul.f32 1.442695, %v637_v7 }
 0x279   : > { %v1003_v12 = vpop.eup %1002  ;;  %1012 = vpow2.f32 %v668_v9  ;;  %692 = vadd.xlane.f32.xlu1 %v1001_v11 }
 0x27a   : > { %686 = vadd.xlane.f32.xlu0 %v1003_v12  ;;  %v1005_v13 = vpop.eup %1004 }
 0x27d   : > { %v1007_v15 = vpop.eup %1006  ;;  %688 = vadd.xlane.f32.xlu1 %v1005_v13 }
 0x27e   : > { %694 = vadd.xlane.f32.xlu0 %v1007_v15 }
 0x27f   : > { %v1009_v17 = vpop.eup %1008 }
 0x281   : > { %v1011_v18 = vpop.eup %1010  ;;  %696 = vadd.xlane.f32.xlu1 %v1009_v17 }
 0x282   : > { %698 = vadd.xlane.f32.xlu0 %v1011_v18 }
 0x283   : > { %v1013_v19 = vpop.eup %1012 }
 0x285   : > { %700 = vadd.xlane.f32.xlu1 %v1013_v19 }
 0x2f2   : > { %v675_v20 = vpop.xlane.xlu0 %674 }
 0x2f3   : > { %1014 = vlog2.f32 %v675_v20 }
 0x2f6   : > { %v677_v22 = vpop.xlane.xlu1 %676  ;;  %v671_v23 = vpop.xlane.xlu0 %670 }
 0x2f7   : > { %1016 = vlog2.f32 %v677_v22 }
 0x2f8   : > { %1018 = vlog2.f32 %v671_v23 }
 0x2fa   : > { %v673_v25 = vpop.xlane.xlu1 %672 }
 0x2fb   : > { %1020 = vlog2.f32 %v673_v25  ;;  %v683_v26 = vpop.xlane.xlu0 %682 }
 0x2fc   : > { %1022 = vlog2.f32 %v683_v26 }
 0x2fd   : > { %v1015_v27 = vpop.eup %1014 }
 0x2fe   : > { %v707_v28 = vmul.f32 0.6931472, %v1015_v27  ;;  %v685_v32 = vpop.xlane.xlu1 %684 }
 0x2ff   : > { %1024 = vlog2.f32 %v685_v32  ;;  %v679_v36 = vpop.xlane.xlu0 %678 }
 0x300   : > { %v736_v38 = vadd.f32 %v707_v28, %v1210_v60  ;;  %1026 = vlog2.f32 %v679_v36 }
 0x301   : > { %v1017_v39 = vpop.eup %1016 }
 0x302   : > { %v1019_v41 = vpop.eup %1018  ;;  %v752_v44 = vsub.f32 %v1162_v29, %v736_v38  ;;  %v709_v47 = vmul.f32 0.6931472, %v1017_v39  ;;  %v681_v49 = vpop.xlane.xlu1 %680 }
 0x303   : > { %v703_v53 = vmul.f32 0.6931472, %v1019_v41  ;;  %1028 = vlog2.f32 %v681_v49  ;;  %v691_v55 = vpop.xlane.xlu0 %690 }
 0x304   : > { %769 = vst.msk [vmem:[%s1280_s28 + $0x10] sm:$0xff] %vm766_vm1, %v752_v44  ;;  %v737_v60 = vadd.f32 %v709_v47, %v1218_v2  ;;  %1030 = vlog2.f32 %v691_v55 }
 0x305   : > { %v1021_v56 = vpop.eup %1020  ;;  %v734_v63 = vadd.f32 %v703_v53, %v1214_v62 }
 0x306   : > { %v1023_v0 = vpop.eup %1022  ;;  %v753_v1 = vsub.f32 %v1168_v34, %v737_v60  ;;  %v705_v5 = vmul.f32 0.6931472, %v1021_v56  ;;  %v693_v29 = vpop.xlane.xlu1 %692 }
 0x307   : > { %v750_v6 = vsub.f32 %v1164_v31, %v734_v63  ;;  %v715_v7 = vmul.f32 0.6931472, %v1023_v0  ;;  %1032 = vlog2.f32 %v693_v29  ;;  %v687_v9 = vpop.xlane.xlu0 %686 }
 0x308   : > { %770 = vst.msk [vmem:[%s1280_s28 + $0x18] sm:$0xff] %vm766_vm1, %v753_v1  ;;  %v735_v2 = vadd.f32 %v705_v5, %v1222_v4  ;;  %1034 = vlog2.f32 %v687_v9 }
 0x309   : > { %v1025_v11 = vpop.eup %1024  ;;  %767 = vst.msk [vmem:[%s1280_s28] sm:$0xff] %vm766_vm1, %v750_v6  ;;  %v740_v62 = vadd.f32 %v715_v7, %v1226_v8 }
 0x30a   : > { %v1027_v34 = vpop.eup %1026  ;;  %v751_v12 = vsub.f32 %v1170_v35, %v735_v2  ;;  %v717_v13 = vmul.f32 0.6931472, %v1025_v11  ;;  %v689_v31 = vpop.xlane.xlu1 %688 }
 0x30b   : > { %v756_v15 = vsub.f32 %v1174_v37, %v740_v62  ;;  %v711_v17 = vmul.f32 0.6931472, %v1027_v34  ;;  %1036 = vlog2.f32 %v689_v31  ;;  %v695_v18 = vpop.xlane.xlu0 %694 }
 0x30c   : > { %768 = vst.msk [vmem:[%s1280_s28 + $0x8] sm:$0xff] %vm766_vm1, %v751_v12  ;;  %v741_v4 = vadd.f32 %v717_v13, %v1230_v10  ;;  %1038 = vlog2.f32 %v695_v18 }
 0x30d   : > { %v1029_v19 = vpop.eup %1028  ;;  %773 = vst.msk [vmem:[%s1280_s28 + $0x30] sm:$0xff] %vm766_vm1, %v756_v15  ;;  %v738_v8 = vadd.f32 %v711_v17, %v1234_v14 }
 0x30e   : > { %v1031_v35 = vpop.eup %1030  ;;  %v757_v20 = vsub.f32 %v1176_v40, %v741_v4  ;;  %v713_v22 = vmul.f32 0.6931472, %v1029_v19  ;;  %v697_v37 = vpop.xlane.xlu1 %696 }
 0x30f   : > { %v754_v23 = vsub.f32 %v1180_v42, %v738_v8  ;;  %v723_v25 = vmul.f32 0.6931472, %v1031_v35  ;;  %1040 = vlog2.f32 %v697_v37  ;;  %v699_v26 = vpop.xlane.xlu0 %698 }
 0x310   : > { %774 = vst.msk [vmem:[%s1280_s28 + $0x38] sm:$0xff] %vm766_vm1, %v757_v20  ;;  %v739_v10 = vadd.f32 %v713_v22, %v1238_v16  ;;  %1042 = vlog2.f32 %v699_v26 }
 0x311   : > { %v1033_v27 = vpop.eup %1032  ;;  %771 = vst.msk [vmem:[%s1280_s28 + $0x20] sm:$0xff] %vm766_vm1, %v754_v23  ;;  %v744_v14 = vadd.f32 %v723_v25, %v1242_v21 }
 0x312   : > { %v1035_v40 = vpop.eup %1034  ;;  %v755_v28 = vsub.f32 %v1182_v43, %v739_v10  ;;  %v725_v42 = vmul.f32 0.6931472, %v1033_v27  ;;  %v701_v32 = vpop.xlane.xlu1 %700 }
 0x313   : > { %v760_v36 = vsub.f32 %v1185_v45, %v744_v14  ;;  %v719_v38 = vmul.f32 0.6931472, %v1035_v40  ;;  %1044 = vlog2.f32 %v701_v32 }
 0x314   : > { %772 = vst.msk [vmem:[%s1280_s28 + $0x28] sm:$0xff] %vm766_vm1, %v755_v28  ;;  %v745_v16 = vadd.f32 %v725_v42, %v1246_v24 }
 0x315   : > { %v1037_v39 = vpop.eup %1036  ;;  %777 = vst.msk [vmem:[%s1280_s28 + $0x50] sm:$0xff] %vm766_vm1, %v760_v36  ;;  %v742_v21 = vadd.f32 %v719_v38, %v1250_v30 }
 0x316   : > { %v1039_v41 = vpop.eup %1038  ;;  %v761_v43 = vsub.f32 %v1188_v48, %v745_v16  ;;  %v721_v44 = vmul.f32 0.6931472, %v1037_v39 }
 0x317   : > { %v758_v45 = vsub.f32 %v1192_v50, %v742_v21  ;;  %v727_v47 = vmul.f32 0.6931472, %v1039_v41 }
 0x318   : > { %778 = vst.msk [vmem:[%s1280_s28 + $0x58] sm:$0xff] %vm766_vm1, %v761_v43  ;;  %v743_v49 = vadd.f32 %v721_v44, %v1254_v33 }
 0x319   : > { %v1041_v53 = vpop.eup %1040  ;;  %775 = vst.msk [vmem:[%s1280_s28 + $0x40] sm:$0xff] %vm766_vm1, %v758_v45  ;;  %v746_v24 = vadd.f32 %v727_v47, %v1258_v46 }
 0x31a   : > { %v1043_v30 = vpop.eup %1042  ;;  %v759_v55 = vsub.f32 %v1194_v51, %v743_v49  ;;  %v729_v48 = vmul.f32 0.6931472, %v1041_v53 }
 0x31b   : > { %v762_v60 = vsub.f32 %v1198_v54, %v746_v24  ;;  %v731_v50 = vmul.f32 0.6931472, %v1043_v30 }
 0x31c   : > { %776 = vst.msk [vmem:[%s1280_s28 + $0x48] sm:$0xff] %vm766_vm1, %v759_v55  ;;  %v747_v56 = vadd.f32 %v729_v48, %v1262_v52 }
 0x31d   : > { %v1045_v33 = vpop.eup %1044  ;;  %779 = vst.msk [vmem:[%s1280_s28 + $0x60] sm:$0xff] %vm766_vm1, %v762_v60  ;;  %v748_v63 = vadd.f32 %v731_v50, %v1266_v61 }
 0x31e   : > { %v763_v46 = vsub.f32 %v1200_v57, %v747_v56  ;;  %v733_v0 = vmul.f32 0.6931472, %v1045_v33 }
 0x31f   : > { %v764_v1 = vsub.f32 %v1203_v58, %v748_v63 }
 0x320   : > { %780 = vst.msk [vmem:[%s1280_s28 + $0x68] sm:$0xff] %vm766_vm1, %v763_v46  ;;  %v749_v51 = vadd.f32 %v733_v0, %v1270_v3 }
 0x321   : > { %781 = vst.msk [vmem:[%s1280_s28 + $0x70] sm:$0xff] %vm766_vm1, %v764_v1 }
 0x322   : > { %v765_v54 = vsub.f32 %v1206_v59, %v749_v51 }
 0x324   : > { %782 = vst.msk [vmem:[%s1280_s28 + $0x78] sm:$0xff] %vm766_vm1, %v765_v54 }
 0x325 PF: > { %s15_s18 = sadd.s32 1, %s1052_s18  }
 0x326   : > { %p12_p4 = scmp.ge.s32.totalorder %s15_s18, 4  }
 0x328   :  { %14 = sbr.rel (!%p12_p4) target bundleno = 1 (0x1), region = 70 }

</bundles_post_ra>
